<compile_context>
chip_gen: v7x
topology: tpu7x:2x2x1
jax: 0.10.0
libtpu: 0.0.40
codegen_flags: <defaults>
</compile_context>

<pallas_src>
import functools
import math

import jax
import jax.numpy as jnp
import numpy as np
from jax.experimental import pallas as pl
from jax.experimental.pallas import tpu as pltpu

_LANES = 128
_MIN_GRID_STEPS = 4              # keep >=4 steps on big problems (v7x 2-TC sharding)
_MIN_SPLIT_TILE_BYTES = 512 << 10
_DEFAULT_TILE_TARGET_BYTES = 4 << 20   # per-tile VMEM per buffer set (x2 double-buffered)


# ---------------------------------------------------------------------------
# Host-side constant tables (hoisted out of the kernel body)
# ---------------------------------------------------------------------------
def _host_freq_odd(d_model):
    """freq[j] = div_term[j//2], odd[j] = 1.0 on cos columns (matches PyTorch)."""
    div_term = np.exp(np.arange(0, d_model, 2, dtype=np.float32)
                      * -(math.log(10000.0) / d_model)).astype(np.float32)
    freq = np.repeat(div_term, 2)[:d_model].astype(np.float32)
    odd = (np.arange(d_model) % 2).astype(np.float32)
    return freq, odd


def _aux_standard(d_model):
    freq, odd = _host_freq_odd(d_model)
    return jnp.asarray(np.stack([freq, odd]))               # (2, d_model) f32


def _aux_dense(d_model):
    """Lane-dense layout tables: each 128-lane row holds k = 128//d_model positions."""
    k = _LANES // d_model
    freq, odd = _host_freq_odd(d_model)
    lane = np.arange(_LANES)
    aux = np.stack([freq[lane % d_model],
                    odd[lane % d_model],
                    (lane // d_model).astype(np.float32)])  # (3, 128) f32
    expand = (lane[None, :] // d_model
              == np.arange(k)[:, None]).astype(np.float32)  # (k, 128) 0/1
    return jnp.asarray(aux), jnp.asarray(expand), k


# ---------------------------------------------------------------------------
# Tile sizing
# ---------------------------------------------------------------------------
def _sublane(elem_bytes):
    # 8 sublanes for 4-byte dtypes, 16 for bf16, 32 for 1-byte (packing).
    return max(8 * (4 // int(elem_bytes)), 8)


def _pick_row_tile(total_rows, bytes_per_row, sublane,
                   target_bytes=_DEFAULT_TILE_TARGET_BYTES):
    total_rows = int(total_rows)
    bytes_per_row = max(int(bytes_per_row), 1)
    if total_rows <= sublane:
        return max(total_rows, 1)
    rows = max(int(target_bytes) // bytes_per_row, sublane)
    # Keep >= _MIN_GRID_STEPS grid steps on large problems (overlap store DMA,
    # shard across v7x's two TensorCores) as long as tiles stay >= 512 KiB.
    min_grid_rows = pl.cdiv(total_rows, _MIN_GRID_STEPS)
    if min_grid_rows * bytes_per_row >= _MIN_SPLIT_TILE_BYTES:
        rows = min(rows, min_grid_rows)
    if rows >= total_rows:
        return total_rows                      # single full-extent block
    return max((rows // sublane) * sublane, sublane)


# ---------------------------------------------------------------------------
# Kernels
# ---------------------------------------------------------------------------
def _pe_from_pos(pos, freq_row, odd_row):
    """pos: (R, C) or (R, 1) f32; freq_row/odd_row: (1, C) f32 resident rows."""
    x = pos * freq_row
    return jnp.where(odd_row > 0.5, jnp.cos(x), jnp.sin(x))


def _range_kernel(aux_ref, o_ref, *, tile_rows):
    # aux_ref: (2, d_model) = [freq, odd]; o_ref: (tile_rows, d_model)
    r0 = pl.program_id(0) * tile_rows
    pos = (r0 + jax.lax.broadcasted_iota(jnp.int32, (tile_rows, 1), 0)
           ).astype(jnp.float32)
    o_ref[...] = _pe_from_pos(pos, aux_ref[0:1, :], aux_ref[1:2, :]).astype(o_ref.dtype)


def _range_dense_kernel(aux_ref, o_ref, *, tile_rows, k):
    # aux_ref: (3, 128) = [freq_tiled, odd_tiled, lane//d_model]; o_ref: (tile_rows, 128)
    r0 = pl.program_id(0) * tile_rows
    sub = jax.lax.broadcasted_iota(jnp.int32, (tile_rows, _LANES), 0)
    pos = ((r0 + sub) * k).astype(jnp.float32) + aux_ref[2:3, :]
    o_ref[...] = _pe_from_pos(pos, aux_ref[0:1, :], aux_ref[1:2, :]).astype(o_ref.dtype)


def _gather_kernel(aux_ref, idx_ref, o_ref):
    # aux_ref: (2, d_model); idx_ref: (tile, 1) int32; o_ref: (tile, d_model)
    pos = idx_ref[...].astype(jnp.float32)
    o_ref[...] = _pe_from_pos(pos, aux_ref[0:1, :], aux_ref[1:2, :]).astype(o_ref.dtype)


def _gather_dense_kernel(aux_ref, expand_ref, idx_ref, o_ref):
    # idx_ref: (tile, k) int32; expand_ref: (k, 128) 0/1 f32.
    # Expand positions across lanes with a tiny matmul on the idle MXU
    # (exact: idx < 2^24 and expand is 0/1).
    pos = jnp.dot(idx_ref[...].astype(jnp.float32), expand_ref[...],
                  preferred_element_type=jnp.float32)        # (tile, 128)
    o_ref[...] = _pe_from_pos(pos, aux_ref[0:1, :], aux_ref[1:2, :]).astype(o_ref.dtype)


# ---------------------------------------------------------------------------
# Kernel 1: forward(data=T)  ->  pe[:T].unsqueeze(0)   shape (1, T, d_model)
# ---------------------------------------------------------------------------
def positional_embedding_range(data_len, d_model, out_dtype=jnp.float32,
                               target_bytes=_DEFAULT_TILE_TARGET_BYTES):
    T = int(data_len)
    assert d_model % 2 == 0, "d_model must be even (as in the PyTorch module)"
    assert T > 0
    elem = jnp.dtype(out_dtype).itemsize
    sub = _sublane(elem)
    dense = (0 < d_model < _LANES and _LANES % d_model == 0
             and (T * d_model) % _LANES == 0)

    if dense:
        aux, _, k = _aux_dense(d_model)
        rows_total = (T * d_model) // _LANES
        out_cols = _LANES
        tile = _pick_row_tile(rows_total, out_cols * elem, sub, target_bytes)
        kernel = functools.partial(_range_dense_kernel, tile_rows=tile, k=k)
        in_specs = [pl.BlockSpec((3, _LANES), lambda i: (0, 0))]
    else:
        aux = _aux_standard(d_model)
        rows_total = T
        out_cols = d_model
        tile = _pick_row_tile(rows_total, out_cols * elem, sub, target_bytes)
        kernel = functools.partial(_range_kernel, tile_rows=tile)
        in_specs = [pl.BlockSpec((2, d_model), lambda i: (0, 0))]

    n_elems = T * d_model
    cost = pl.CostEstimate(flops=3 * n_elems,
                           transcendentals=2 * n_elems,
                           bytes_accessed=int(n_elems * elem + aux.size * 4))
    pe = pl.pallas_call(
        kernel,
        out_shape=jax.ShapeDtypeStruct((rows_total, out_cols), out_dtype),
        grid=(pl.cdiv(rows_total, tile),),
        in_specs=in_specs,
        out_specs=pl.BlockSpec((tile, out_cols), lambda i: (i, 0)),
        compiler_params=pltpu.CompilerParams(dimension_semantics=("parallel",)),
        cost_estimate=cost,
    )(aux)
    return pe.reshape(T, d_model)[None]   # row-major reshape: free


# ---------------------------------------------------------------------------
# Kernel 2: forward(idx=idx) (idx: (B, L) int) -> (B, L, d_model)
#           pe.unsqueeze(0).repeat(B,1,1)[arange(B)[:,None], idx, :]
# ---------------------------------------------------------------------------
def positional_embedding_gather(idx, d_model, out_dtype=jnp.float32,
                                target_bytes=_DEFAULT_TILE_TARGET_BYTES):
    assert d_model % 2 == 0, "d_model must be even (as in the PyTorch module)"
    idx = jnp.asarray(idx, dtype=jnp.int32)
    B, L = idx.shape
    N = B * L
    assert N > 0
    elem = jnp.dtype(out_dtype).itemsize
    sub = _sublane(elem)
    dense = (0 < d_model < _LANES and _LANES % d_model == 0
             and (N * d_model) % _LANES == 0)

    if dense:
        aux, expand, k = _aux_dense(d_model)
        rows_total = (N * d_model) // _LANES          # == N // k
        out_cols = _LANES
        idx_in = idx.reshape(rows_total, k)
        # out row + idx block row (k int32 lanes padded to a full 128-lane row)
        bytes_per_row = out_cols * elem + 4 * _LANES
        tile = _pick_row_tile(rows_total, bytes_per_row, sub, target_bytes)
        kernel = _gather_dense_kernel
        in_specs = [pl.BlockSpec((3, _LANES), lambda i: (0, 0)),
                    pl.BlockSpec((k, _LANES), lambda i: (0, 0)),
                    pl.BlockSpec((tile, k), lambda i: (i, 0))]
        args = (aux, expand, idx_in)
        aux_bytes = int(aux.size * 4 + expand.size * 4)
    else:
        aux = _aux_standard(d_model)
        rows_total = N                                 # batch flattened into rows
        out_cols = d_model
        idx_in = idx.reshape(N, 1)
        bytes_per_row = out_cols * elem + 4 * _LANES   # padded (tile,1) idx rows
        tile = _pick_row_tile(rows_total, bytes_per_row, sub, target_bytes)
        kernel = _gather_kernel
        in_specs = [pl.BlockSpec((2, d_model), lambda i: (0, 0)),
                    pl.BlockSpec((tile, 1), lambda i: (i, 0))]
        args = (aux, idx_in)
        aux_bytes = int(aux.size * 4)

    n_elems = N * d_model
    cost = pl.CostEstimate(flops=3 * n_elems,
                           transcendentals=2 * n_elems,
                           bytes_accessed=int(n_elems * elem + N * 4 + aux_bytes))
    out = pl.pallas_call(
        kernel,
        out_shape=jax.ShapeDtypeStruct((rows_total, out_cols), out_dtype),
        grid=(pl.cdiv(rows_total, tile),),
        in_specs=in_specs,
        out_specs=pl.BlockSpec((tile, out_cols), lambda i: (i, 0)),
        compiler_params=pltpu.CompilerParams(dimension_semantics=("parallel",)),
        cost_estimate=cost,
    )(*args)
    return out.reshape(B, L, d_model)   # row-major reshape: free


# ---------------------------------------------------------------------------
# Module-like wrapper
# ---------------------------------------------------------------------------
class PositionalEmbedding:
    def __init__(self, d_model, max_len=5000, out_dtype=jnp.float32):
        assert d_model % 2 == 0, "d_model must be even (as in the PyTorch module)"
        self.d_model = d_model
        self.max_len = max_len          # analytic PE: no (max_len, d_model) buffer
        self.out_dtype = out_dtype      # set jnp.bfloat16 if the consumer is bf16

    def __call__(self, data=None, idx=None):
        if data is not None:
            return positional_embedding_range(int(data), self.d_model, self.out_dtype)
        return positional_embedding_gather(idx, self.d_model, self.out_dtype)


# ---------------------------------------------------------------------------
# Pure-numpy reference (mirrors the PyTorch buffer construction)
# ---------------------------------------------------------------------------
def _reference_pe_table(max_len, d_model):
    pe = np.zeros((max_len, d_model), dtype=np.float32)
    position = np.arange(0, max_len, dtype=np.float32)[:, None]
    div_term = np.exp(np.arange(0, d_model, 2, dtype=np.float32)
                      * -(math.log(10000.0) / d_model))
    pe[:, 0::2] = np.sin(position * div_term)
    pe[:, 1::2] = np.cos(position * div_term)
    return pe


if __name__ == "__main__":
    rtol, atol = 1e-5, 1e-5   # only EUP-vs-libm sin/cos differences remain

    # -------- config 1: d_model=32 -> lane-dense (128 % 32 == 0) paths --------
    d_model, max_len = 32, 64
    B, L, T = 2, 8, 16
    mod = PositionalEmbedding(d_model, max_len=max_len)
    ref_pe = _reference_pe_table(max_len, d_model)

    out1 = jax.block_until_ready(mod(data=T))
    assert out1.shape == (1, T, d_model), out1.shape
    np.testing.assert_allclose(np.asarray(out1), ref_pe[:T][None], rtol=rtol, atol=atol)

    idx = jax.random.randint(jax.random.PRNGKey(0), (B, L), 0, max_len, dtype=jnp.int32)
    out2 = jax.block_until_ready(mod(idx=idx))
    idx_np = np.asarray(idx)
    ref2 = ref_pe[None].repeat(B, axis=0)[np.arange(B)[:, None], idx_np, :]
    assert out2.shape == (B, L, d_model), out2.shape
    np.testing.assert_allclose(np.asarray(out2), ref2, rtol=rtol, atol=atol)

    # -------- config 2: d_model=96 -> standard fallback (128 % 96 != 0) --------
    d_model2 = 96
    mod2 = PositionalEmbedding(d_model2, max_len=max_len)
    ref_pe2 = _reference_pe_table(max_len, d_model2)

    T2 = 10
    out3 = jax.block_until_ready(mod2(data=T2))
    assert out3.shape == (1, T2, d_model2), out3.shape
    np.testing.assert_allclose(np.asarray(out3), ref_pe2[:T2][None], rtol=rtol, atol=atol)

    idx2 = jax.random.randint(jax.random.PRNGKey(1), (2, 4), 0, max_len, dtype=jnp.int32)
    out4 = jax.block_until_ready(mod2(idx=idx2))
    ref4 = ref_pe2[None].repeat(2, axis=0)[np.arange(2)[:, None], np.asarray(idx2), :]
    assert out4.shape == (2, 4, d_model2), out4.shape
    np.testing.assert_allclose(np.asarray(out4), ref4, rtol=rtol, atol=atol)

    print("KERNEL_OK")
</pallas_src>

<mosaic_0001>
module attributes {stable_mosaic.version = 11 : i64} {
  func.func @_range_dense_kernel(%arg0: i32, %arg1: memref<3x128xf32, #tpu.memory_space<vmem>>, %arg2: memref<4x128xf32, #tpu.memory_space<vmem>>) attributes {dimension_semantics = [#tpu.dimension_semantics<parallel>], iteration_bounds = array<i64: 1>, scalar_prefetch = 0 : i64, scratch_operands = 0 : i64, tpu.core_type = #tpu.core_type<tc>, window_params = [{pipeline_mode = #tpu.pipeline_mode<synchronous>, transform_indices = @transform_0, window_bounds = array<i64: 3, 128>}, {transform_indices = @transform_1, window_bounds = array<i64: 4, 128>}]} {
    %c4_i32 = arith.constant 4 : i32
    %0 = arith.muli %arg0, %c4_i32 : i32
    %1 = tpu.iota {dimensions = array<i32: 0>} : vector<4x128xi32>
    %2 = vector.broadcast %0 : i32 to vector<4x128xi32>
    %3 = arith.addi %2, %1 : vector<4x128xi32>
    %c4_i32_0 = arith.constant 4 : i32
    %4 = vector.broadcast %c4_i32_0 : i32 to vector<4x128xi32>
    %5 = arith.muli %3, %4 : vector<4x128xi32>
    %6 = arith.sitofp %5 : vector<4x128xi32> to vector<4x128xf32>
    %c2 = arith.constant 2 : index
    %c0 = arith.constant 0 : index
    %7 = vector.load %arg1[%c2, %c0] : memref<3x128xf32, #tpu.memory_space<vmem>>, vector<1x128xf32>
    %8 = vector.broadcast %7 : vector<1x128xf32> to vector<4x128xf32>
    %9 = arith.addf %6, %8 : vector<4x128xf32>
    %c0_1 = arith.constant 0 : index
    %c0_2 = arith.constant 0 : index
    %10 = vector.load %arg1[%c0_1, %c0_2] : memref<3x128xf32, #tpu.memory_space<vmem>>, vector<1x128xf32>
    %c1 = arith.constant 1 : index
    %c0_3 = arith.constant 0 : index
    %11 = vector.load %arg1[%c1, %c0_3] : memref<3x128xf32, #tpu.memory_space<vmem>>, vector<1x128xf32>
    %12 = vector.broadcast %10 : vector<1x128xf32> to vector<4x128xf32>
    %13 = arith.mulf %9, %12 : vector<4x128xf32>
    %cst = arith.constant 5.000000e-01 : f32
    %14 = vector.broadcast %cst : f32 to vector<1x128xf32>
    %15 = arith.cmpf ogt, %11, %14 : vector<1x128xf32>
    %16 = math.cos %13 : vector<4x128xf32>
    %17 = math.sin %13 : vector<4x128xf32>
    %18 = vector.shape_cast %15 : vector<1x128xi1> to vector<1x128xi1>
    %19 = vector.broadcast %18 : vector<1x128xi1> to vector<4x128xi1>
    %20 = arith.select %19, %16, %17 : vector<4x128xi1>, vector<4x128xf32>
    %c0_4 = arith.constant 0 : index
    %c0_5 = arith.constant 0 : index
    %21 = vector.load %arg2[%c0_4, %c0_5] : memref<4x128xf32, #tpu.memory_space<vmem>>, vector<4x128xf32>
    tpu.vector_store %arg2[%c0_4, %c0_5], %20 {strides = array<i32>} : memref<4x128xf32, #tpu.memory_space<vmem>>, vector<4x128xf32>,
    return
  }
  func.func @transform_0(%arg0: i32) -> (i32, i32) {
    %c0_i32 = arith.constant 0 : i32
    %c0_i32_0 = arith.constant 0 : i32
    %c0_i32_1 = arith.constant 0 : i32
    return %c0_i32, %c0_i32_0 : i32, i32
  }
  func.func @transform_1(%arg0: i32) -> (i32, i32) {
    %c0_i32 = arith.constant 0 : i32
    %c0_i32_0 = arith.constant 0 : i32
    return %arg0, %c0_i32 : i32, i32
  }
}

</mosaic_0001>

<bundles_post_ra>
// kernel: tpu_custom_call.1
= control target key start
LH: loop header
LB: loop body
LE: loop exit
PB: predicated region body
PF: predicated region fallthrough
CT: control target
= control target key end

     0   :  { %6 = vsyncpa [#allocation3], 0  ;;  %s415_s0 = inlined_call_operand.hbm [shape: f32[3,128], index: 0, kind: input, shape index: {}]   ;;  %s416_s1 = inlined_call_operand.hbm [shape: f32[4,128], index: 1, kind: output, shape index: {}]  }
   0x1   :  { %7 = vsyncpa [#allocation4], 0  ;;  %s347_s6 = smov [#allocation2]   ;;  %s299_s10 = scalar_lea.hbm %s415_s0, 64 }
   0x2   :  { %s14_s7 = sshll.u32 %s347_s6, 4  ;;  %p300_p0 = scmp.ne.s32.totalorder %s415_s0, %s299_s10  ;;  %s15_s7 = int_to_ptr.vmem [resolvable:$true] %s14_s7 }
   0x3   :  { %p303_p1 = scmp.lt.u32.totalorder %s299_s10, %s415_s0 }
   0x5   :  { %p305_p2 = pnand %p303_p1, %p300_p0 }
   0x7   :  { %308 = shalt.err (!%p305_p2)
}
   0x8   :  { %s309_s15 = scalar_lea.vmem %s15_s7, 64  ;;  %p314_p4 = scmp.lt.s32.totalorder %s15_s7, %s15_s7 }
   0x9   :  { %p310_p3 = scmp.ne.s32.totalorder %s15_s7, %s309_s15  ;;  %p315_p5 = scmp.lt.s32.totalorder %s309_s15, %s309_s15 }
   0xb   :  { %p316_p6 = por %p315_p5, %p314_p4 }
   0xd   :  { %p317_p7 = pnand %p316_p6, %p310_p3 }
   0xf   :  { %320 = shalt.err (!%p317_p7)
}
  0x10   :  { %17 = dma.hbm_to_vmem [thread:$0]  %s415_s0, 64, %s15_s7, [#allocation3]  }
  0x11   :  { %343 = dma.done.wait [#allocation3], 64  }
  0x12   :  { %344 = vsyncadd [#allocation3], 4294967232  ;;  %v22_v0 = vlaneseq  ;;  %v272_v4 = vld [vmem:[#allocation2 + $0x2] ss:$0 sm:$0xff]  ;;  %v273_v5 = vld [vmem:[#allocation2] ss:$0 sm:$0xff] }
  0x13   :  { %v348_v19 = vmov 683565275   ;;  %v349_v21 = vmov 2475754826   ;;  %v350_v23 = vmov 2131351028  }
  0x14   :  { %v378_v1 = vshrl.u32 %v22_v0, 7  ;;  %v351_v25 = vmov 2102212464   ;;  %v352_v27 = vmov 920167782   ;;  %s355_s0 = smov [#allocation5]  }
  0x15   :  { %v353_v34 = vmov 1326507024   ;;  %s263_s18 = sshll.u32 %s355_s0, 4  ;;  %s264_s18 = int_to_ptr.vmem [resolvable:$true] %s263_s18 }
  0x16   :  { %v26_v2 = vmul.u32 4, %v378_v1  ;;  %s321_s19 = scalar_lea.vmem %s264_s18, 64  ;;  %p326_p9 = scmp.lt.s32.totalorder %s264_s18, %s264_s18 }
  0x17   :  { %p322_p8 = scmp.ne.s32.totalorder %s264_s18, %s321_s19  ;;  %p327_p10 = scmp.lt.s32.totalorder %s321_s19, %s321_s19 }
  0x18   :  { %v27_v3 = vcvt.s32.f32 %v26_v2 }
  0x19   :  { %p328_p11 = por %p327_p10, %p326_p9 }
  0x1a   :  { %v33_v6 = vadd.f32 %v272_v4, %v27_v3 }
  0x1b   :  { %p329_p12 = pnand %p328_p11, %p322_p8 }
  0x1c   :  { %v381_v7 = vmul.f32 %v273_v5, %v33_v6 }
  0x1e   :  { %v45_v8 = vand.u32 2139095040, %v381_v7  ;;  %v42_v10 = vand.u32 2147483647, %v381_v7  ;;  %vm44_vm7 = vcmp.lt.s32.totalorder %v381_v7, 0 }
  0x20   :  { %v46_v9 = vshrl.u32 %v45_v8, 23  ;;  %v49_v13 = vand.u32 8388607, %v42_v10  ;;  %vm43_vm8 = vcmp.le.f32.partialorder %v42_v10, 0.7853982 }
  0x22   :  { %v274_v11 = vadd.s32 4294967169, %v46_v9  ;;  %v50_v16 = vor.u32 8388608, %v49_v13 }
  0x24   :  { %v52_v12 = vadd.s32 1, %v274_v11  ;;  %v90_v36 = vshll.u32 %v50_v16, 8 }
  0x26   :  { %vm53_vm0 = vcmp.gt.s32.totalorder %v52_v12, 0 }
  0x27   :  { %v54_v14 = vsel %vm53_vm0, %v52_v12, 0  ;;  %vm134_vm0 = vweird.f32 %v381_v7 }
  0x28   :  { %v56_v15 = vand.u32 31, %v54_v14  ;;  %v55_v17 = vshrl.u32 %v54_v14, 5 }
  0x2a   :  { %v57_v18 = vsub.s32 32, %v56_v15  ;;  %v59_v20 = vshll.u32 %v348_v19, %v56_v15  ;;  %v62_v22 = vshll.u32 %v349_v21, %v56_v15  ;;  %v65_v24 = vshll.u32 %v350_v23, %v56_v15 }
  0x2b   :  { %v68_v26 = vshll.u32 %v351_v25, %v56_v15  ;;  %v71_v28 = vshll.u32 %v352_v27, %v56_v15  ;;  %vm74_vm1 = vcmp.lt.s32.totalorder %v55_v17, 1  ;;  %vm77_vm2 = vcmp.lt.s32.totalorder %v55_v17, 4 }
  0x2c   :  { %v58_v29 = vshrl.u32 %v348_v19, %v57_v18  ;;  %v60_v30 = vshrl.u32 %v349_v21, %v57_v18  ;;  %v63_v31 = vshrl.u32 %v350_v23, %v57_v18  ;;  %v66_v32 = vshrl.u32 %v351_v25, %v57_v18 }
  0x2d   :  { %v69_v33 = vshrl.u32 %v352_v27, %v57_v18  ;;  %v72_v35 = vshrl.u32 %v353_v34, %v57_v18  ;;  %vm75_vm3 = vcmp.lt.s32.totalorder %v55_v17, 2  ;;  %vm76_vm4 = vcmp.lt.s32.totalorder %v55_v17, 3 }
  0x2e   :  { %v61_v37 = vor.u32 %v60_v30, %v59_v20  ;;  %v64_v38 = vor.u32 %v63_v31, %v62_v22  ;;  %v67_v39 = vor.u32 %v66_v32, %v65_v24  ;;  %v252_v32 = vsub.s32 0, %v378_v1 }
  0x2f   :  { %v70_v40 = vor.u32 %v69_v33, %v68_v26  ;;  %v73_v41 = vor.u32 %v72_v35, %v71_v28  ;;  %v35_v28 = vld [vmem:[#allocation2 + $0x1] sm:$0x1]  ;;  %v354_v33 = vmov 0  }
  0x30   :  { %v78_v42 = vsel %vm74_vm1, %v58_v29, %v61_v37  ;;  %v79_v43 = vsel %vm77_vm2, %v67_v39, 2102212464  ;;  %v82_v44 = vsel %vm74_vm1, %v61_v37, %v64_v38  ;;  %v86_v45 = vsel %vm74_vm1, %v64_v38, %v67_v39 }
  0x31   :  { %v80_v46 = vsel %vm76_vm4, %v64_v38, %v79_v43  ;;  %v83_v47 = vsel %vm77_vm2, %v70_v40, 920167782  ;;  %v87_v48 = vsel %vm77_vm2, %v73_v41, 1326507024  ;;  %vm41_vm9 = vcmp.gt.f32.partialorder %v35_v28, 0.5 }
  0x32   :  { %v84_v49 = vsel %vm76_vm4, %v67_v39, %v83_v47  ;;  %v88_v50 = vsel %vm76_vm4, %v70_v40, %v87_v48  ;;  %v81_v51 = vsel %vm75_vm3, %v78_v42, %v80_v46  ;;  %v249_v34 = vsel %vm41_vm9, 1, %v354_v33 }
  0x33   :  { %v85_v52 = vsel %vm75_vm3, %v82_v44, %v84_v49  ;;  %v89_v53 = vsel %vm75_vm3, %v86_v45, %v88_v50  ;;  %v97_v58 = vmul.u32 %v90_v36, %v81_v51  ;;  %v253_v10 = vrot.slane %v249_v34, %v252_v32 }
  0x34   :  { %v387_v54 = vmul.u32.u64.low %v90_v36, %v89_v53  ;;  %v388_v55 = vmul.u32.u64.high %v90_v36, %v89_v53, %v387_v54  ;;  %v390_v56 = vmul.u32.u64.low %v90_v36, %v85_v52  ;;  %v391_v57 = vmul.u32.u64.high %v90_v36, %v85_v52, %v390_v56 }
  0x35   :  { %vm254_vm1 = vcmp.eq.s32.totalorder %v253_v10, 1 }
  0x36   :  { %vm99_vm5 = vc.u32 %v388_v55, %v390_v56  ;;  %v100_v59 = vadd.s32 1, %v391_v57  ;;  %v98_v8 = vadd.s32 %v390_v56, %v388_v55 }
  0x38   :  { %v101_v60 = vsel %vm99_vm5, %v100_v59, %v391_v57 }
  0x39   :  { %v102_v61 = vadd.s32 %v101_v60, %v97_v58 }
  0x3b   :  { %v103_v62 = vadd.s32 536870912, %v102_v61 }
  0x3d   :  { %v104_v63 = vshrl.u32 %v103_v62, 30 }
  0x3f   :  { %v105_v0 = vshll.u32 %v104_v63, 30  ;;  %v128_v21 = vsub.s32 4, %v104_v63 }
  0x41   :  { %v106_v2 = vsub.s32 %v102_v61, %v105_v0  ;;  %v129_v24 = vsel %vm44_vm7, %v128_v21, %v104_v63 }
  0x42   :  { %v131_v27 = vsel %vm43_vm8, 0, %v129_v24 }
  0x43   :  { %v108_v3 = vsub.s32 0, %v106_v2  ;;  %v238_v29 = vadd.s32 3, %v131_v27  ;;  %v135_v30 = vand.u32 3, %v131_v27 }
  0x45   :  { %v275_v4 = vmin.u32 %v108_v3, %v106_v2  ;;  %v239_v31 = vand.u32 3, %v238_v29  ;;  %vm140_vm10 = vcmp.eq.s32.totalorder %v135_v30, 2  ;;  %vm137_vm12 = vcmp.eq.s32.totalorder %v135_v30, 0 }
  0x46   :  { %vm136_vm14 = vcmp.lt.s32.totalorder %v135_v30, 2 }
  0x47   :  { %v110_v5 = vclz %v275_v4  ;;  %vm244_vm11 = vcmp.eq.s32.totalorder %v239_v31, 2  ;;  %vm241_vm13 = vcmp.eq.s32.totalorder %v239_v31, 0  ;;  %vm240_vm15 = vcmp.lt.s32.totalorder %v239_v31, 2 }
  0x49   :  { %v276_v6 = vadd.s32 4294967294, %v110_v5 }
  0x4b   :  { %vm277_vm6 = vcmp.lt.s32.totalorder %v276_v6, 0 }
  0x4c   :  { %v113_v9 = vsel %vm277_vm6, 0, %v276_v6 }
  0x4d   :  { %v114_v11 = vsub.s32 32, %v113_v9  ;;  %v115_v12 = vshll.u32 %v106_v2, %v113_v9  ;;  %v118_v13 = vsub.s32 4294967266, %v113_v9 }
  0x4f   :  { %v116_v14 = vshrl.u32 %v98_v8, %v114_v11  ;;  %v119_v15 = vadd.s32 127, %v118_v13 }
  0x51   :  { %v117_v16 = vor.u32 %v116_v14, %v115_v12  ;;  %v120_v17 = vshll.u32 %v119_v15, 23 }
  0x53   :  { %v121_v18 = vor.u32 4788187, %v120_v17  ;;  %v124_v19 = vcvt.s32.f32 %v117_v16 }
  0x55   :  { %v122_v20 = vand.u32 2147483647, %v121_v18 }
  0x57   :  { %v125_v22 = vmul.f32 %v124_v19, %v122_v20 }
  0x59   :  { %v126_v23 = vxor.u32 2147483648, %v125_v22 }
  0x5b   :  { %v127_v25 = vsel %vm44_vm7, %v126_v23, %v125_v22 }
  0x5c   :  { %v130_v26 = vsel %vm43_vm8, %v381_v7, %v127_v25 }
  0x5d   :  { %295 = vcosq.f32 %v130_v26 }
  0x5e   :  { %297 = vsinq.f32 %v130_v26 }
  0x67   :  { %v296_v35 = vpop.eup %295 }
  0x68   :  { %v298_v36 = vpop.eup %297  ;;  %v141_v37 = vxor.u32 2147483648, %v296_v35 }
  0x69   :  { %v138_v38 = vxor.u32 2147483648, %v298_v36 }
  0x6a   :  { %v142_v39 = vsel %vm140_vm10, %v141_v37, %v298_v36  ;;  %v246_v40 = vsel %vm244_vm11, %v141_v37, %v298_v36 }
  0x6b   :  { %v139_v1 = vsel %vm137_vm12, %v296_v35, %v138_v38  ;;  %v243_v41 = vsel %vm241_vm13, %v296_v35, %v138_v38 }
  0x6c   :  { %v143_v42 = vsel %vm136_vm14, %v139_v1, %v142_v39  ;;  %v247_v43 = vsel %vm240_vm15, %v243_v41, %v246_v40 }
  0x6d   :  { %v144_v44 = vsel %vm134_vm0, nan, %v143_v42  ;;  %v248_v45 = vsel %vm134_vm0, nan, %v247_v43 }
  0x6e   :  { %v255_v46 = vsel %vm254_vm1, %v144_v44, %v248_v45 }
  0x6f   :  { %256 = vst [vmem:[#allocation5] sm:$0xf] %v255_v46 }
  0x70   :  { %332 = shalt.err (!%p329_p12)
}
  0x71   :  { %s333_s22 = scalar_lea.hbm %s416_s1, 64 }
  0x72   :  { %p334_p13 = scmp.ne.s32.totalorder %s416_s1, %s333_s22  ;;  %p337_p0 = scmp.lt.u32.totalorder %s333_s22, %s416_s1 }
  0x74   :  { %p339_p1 = pnand %p337_p0, %p334_p13 }
  0x76   :  { %342 = shalt.err (!%p339_p1)
}
  0x77   :  { %266 = dma.vmem_to_hbm [thread:$0]  %s264_s18, 64, %s416_s1, [#allocation4]  }
  0x78   :  { %345 = dma.done.wait [#allocation4], 64  }
  0x79   :  { %346 = vsyncadd [#allocation4], 4294967232 }
  0x7a   :  { %270 = vsyncpa [#allocation3], 1 }
  0x7b   :  { %271 = vsyncpa [#allocation4], 1 }

</bundles_post_ra>
